<compile_context>
chip_gen: v6e
topology: v6e:2x2x1
jax: 0.10.0
libtpu: 0.0.40
codegen_flags: <defaults>
</compile_context>

<pallas_src>
import numpy as np
import jax
import jax.numpy as jnp
from jax.experimental import pallas as pl
from jax.experimental.pallas import tpu as pltpu

_K_H = np.array([[1, 2, 1], [0, 0, 0], [-1, -2, -1]], np.float32)
_K_V = np.array([[1, 0, -1], [2, 0, -2], [1, 0, -1]], np.float32)
_K_HV = np.array([[0, 1, 2], [-1, 0, 1], [-2, -1, 0]], np.float32)
_K_VH = np.array([[2, 1, 0], [1, 0, -1], [0, -1, -2]], np.float32)
_KERNELS = (_K_H, _K_V, _K_HV, _K_VH)


def _make_sobel_loss_kernel(C, H, W):
    Hout, Wout = H - 2, W - 2

    def kernel(inp_ref, tgt_ref, out_ref):
        # Channel-summed difference image, accumulated channel-by-channel so no
        # (Bt, C, H, W) f32 temporary is ever materialized in VMEM.
        d = inp_ref[:, 0].astype(jnp.float32) - tgt_ref[:, 0].astype(jnp.float32)
        for c in range(1, C):
            d = d + (inp_ref[:, c].astype(jnp.float32)
                     - tgt_ref[:, c].astype(jnp.float32))

        # Row (sublane) shifted views, shared by all four filters.
        d0 = d[:, 0:Hout, :]
        d1 = d[:, 1:Hout + 1, :]
        d2 = d[:, 2:Hout + 2, :]
        p = d0 - d2              # vertical [1, 0, -1]
        r = (d0 + d2) + d1       # vertical [1, 1, 1]

        # Column (lane) shifted views, built once per operand.
        p0 = p[..., 0:Wout]
        p1 = p[..., 1:Wout + 1]
        p2 = p[..., 2:Wout + 2]
        r0 = r[..., 0:Wout]
        r2 = r[..., 2:Wout + 2]
        c1 = d1[..., 0:Wout] - d1[..., 2:Wout + 2]

        a = (p0 + p2) + p1       # [1,0,-1] x [1,1,1]
        b = r0 - r2              # [1,1,1] x [1,0,-1]

        g_h = a + p1             # kernel_h  = [1,0,-1] x [1,2,1]
        g_v = b + c1             # kernel_v  = [1,2,1] x [1,0,-1]
        g_hv = a - b             # kernel_hv
        g_vh = a + b             # kernel_vh

        total = (jnp.abs(g_h) + jnp.abs(g_v)) + (jnp.abs(g_hv) + jnp.abs(g_vh))
        # Per-step partial sum reduced to a scalar inside the kernel.
        out_ref[...] = jnp.sum(total, keepdims=True)

    return kernel


def _pick_block_batch(B, C, H, W, itemsize, vmem_budget=24 << 20):
    """Largest divisor Bt of B keeping >=2 grid steps (when B>=2) and fitting VMEM."""
    best = 1
    for bt in range(1, B + 1):
        if B % bt:
            continue
        steps = B // bt
        if B >= 2 and steps < 2:
            continue
        in_bytes = 2 * 2 * bt * C * H * W * itemsize     # 2 inputs, double-buffered
        interm = 20 * bt * H * W * 4                     # f32 intermediates (generous)
        if in_bytes + interm > vmem_budget:
            continue
        best = bt
    return best


def advanced_sobel_loss(inputs, targets):
    """Matches AdvancedSobelLoss.forward(inputs, targets)."""
    B, C, H, W = inputs.shape
    if H < 3 or W < 3:
        raise ValueError("spatial dims must be >= 3 for a valid 3x3 conv")

    itemsize = np.dtype(inputs.dtype).itemsize
    Bt = _pick_block_batch(B, C, H, W, itemsize)
    nsteps = B // Bt

    kernel = _make_sobel_loss_kernel(C, H, W)

    # VMEM limit from actual block sizes + headroom, capped well below v7x's
    # 64 MiB per-TensorCore physical VMEM.
    in_bytes = 2 * 2 * Bt * C * H * W * itemsize
    interm = 20 * Bt * H * W * 4
    vmem_limit = int(min(max(2 * (in_bytes + interm), 16 << 20), 48 << 20))

    partials = pl.pallas_call(
        kernel,
        out_shape=jax.ShapeDtypeStruct((nsteps, 1, 1), jnp.float32),
        grid_spec=pltpu.PrefetchScalarGridSpec(
            num_scalar_prefetch=0,
            grid=(nsteps,),
            in_specs=[
                pl.BlockSpec((Bt, C, H, W), lambda s: (s, 0, 0, 0)),
                pl.BlockSpec((Bt, C, H, W), lambda s: (s, 0, 0, 0)),
            ],
            out_specs=pl.BlockSpec((1, 1, 1), lambda s: (s, 0, 0)),
        ),
        compiler_params=pltpu.CompilerParams(
            dimension_semantics=("parallel",),
            vmem_limit_bytes=vmem_limit),
    )(inputs, targets)

    n_pixel = B * H * W
    return jnp.sum(partials) / n_pixel


def _ref(inputs, targets):
    """Pure-JAX mirror of the PyTorch module (for validation)."""
    n, c, h, w = inputs.shape
    inputs = inputs.astype(jnp.float32)
    targets = targets.astype(jnp.float32)

    def conv(x, k):
        w4 = jnp.broadcast_to(jnp.asarray(k, jnp.float32)[None, None],
                              (1, c, 3, 3))
        return jax.lax.conv_general_dilated(
            x, w4, window_strides=(1, 1), padding="VALID")

    loss = jnp.float32(0.0)
    for k in _KERNELS:
        loss = loss + jnp.sum(jnp.abs(conv(inputs, k) - conv(targets, k)))
    return loss / (n * h * w)


if __name__ == "__main__":
    key = jax.random.PRNGKey(0)
    k1, k2 = jax.random.split(key)
    # The module's filters are expand(1, 3, 3, 3) -> inputs must have 3 channels.
    B, C, H, W = 2, 3, 16, 16
    inputs = jax.random.uniform(k1, (B, C, H, W), dtype=jnp.float32)
    targets = jax.random.uniform(k2, (B, C, H, W), dtype=jnp.float32)

    out = jax.block_until_ready(advanced_sobel_loss(inputs, targets))
    ref = jax.block_until_ready(_ref(inputs, targets))

    np.testing.assert_allclose(np.asarray(out), np.asarray(ref),
                               rtol=1e-5, atol=1e-5)
    print("KERNEL_OK")
</pallas_src>

<mosaic_0001>
module attributes {stable_mosaic.version = 11 : i64} {
  func.func @kernel(%arg0: i32, %arg1: memref<1x3x16x16xf32, #tpu.memory_space<vmem>>, %arg2: memref<1x3x16x16xf32, #tpu.memory_space<vmem>>, %arg3: memref<1x1x1xf32, #tpu.memory_space<vmem>>) attributes {dimension_semantics = [#tpu.dimension_semantics<parallel>], iteration_bounds = array<i64: 2>, scalar_prefetch = 0 : i64, scratch_operands = 0 : i64, tpu.core_type = #tpu.core_type<tc>, window_params = [{transform_indices = @transform_0, window_bounds = array<i64: 1, 3, 16, 16>}, {transform_indices = @transform_1, window_bounds = array<i64: 1, 3, 16, 16>}, {transform_indices = @transform_2, window_bounds = array<i64: 1, 1, 1>}]} {
    %c0 = arith.constant 0 : index
    %c0_0 = arith.constant 0 : index
    %c0_1 = arith.constant 0 : index
    %c0_2 = arith.constant 0 : index
    %0 = vector.load %arg1[%c0, %c0_0, %c0_1, %c0_2] : memref<1x3x16x16xf32, #tpu.memory_space<vmem>>, vector<1x1x16x16xf32>
    %1 = vector.shape_cast %0 : vector<1x1x16x16xf32> to vector<1x16x16xf32>
    %c0_3 = arith.constant 0 : index
    %c0_4 = arith.constant 0 : index
    %c0_5 = arith.constant 0 : index
    %c0_6 = arith.constant 0 : index
    %2 = vector.load %arg2[%c0_3, %c0_4, %c0_5, %c0_6] : memref<1x3x16x16xf32, #tpu.memory_space<vmem>>, vector<1x1x16x16xf32>
    %3 = vector.shape_cast %2 : vector<1x1x16x16xf32> to vector<1x16x16xf32>
    %4 = arith.subf %1, %3 : vector<1x16x16xf32>
    %c0_7 = arith.constant 0 : index
    %c1 = arith.constant 1 : index
    %c0_8 = arith.constant 0 : index
    %c0_9 = arith.constant 0 : index
    %5 = vector.load %arg1[%c0_7, %c1, %c0_8, %c0_9] : memref<1x3x16x16xf32, #tpu.memory_space<vmem>>, vector<1x1x16x16xf32>
    %6 = vector.shape_cast %5 : vector<1x1x16x16xf32> to vector<1x16x16xf32>
    %c0_10 = arith.constant 0 : index
    %c1_11 = arith.constant 1 : index
    %c0_12 = arith.constant 0 : index
    %c0_13 = arith.constant 0 : index
    %7 = vector.load %arg2[%c0_10, %c1_11, %c0_12, %c0_13] : memref<1x3x16x16xf32, #tpu.memory_space<vmem>>, vector<1x1x16x16xf32>
    %8 = vector.shape_cast %7 : vector<1x1x16x16xf32> to vector<1x16x16xf32>
    %9 = arith.subf %6, %8 : vector<1x16x16xf32>
    %10 = arith.addf %4, %9 : vector<1x16x16xf32>
    %c0_14 = arith.constant 0 : index
    %c2 = arith.constant 2 : index
    %c0_15 = arith.constant 0 : index
    %c0_16 = arith.constant 0 : index
    %11 = vector.load %arg1[%c0_14, %c2, %c0_15, %c0_16] : memref<1x3x16x16xf32, #tpu.memory_space<vmem>>, vector<1x1x16x16xf32>
    %12 = vector.shape_cast %11 : vector<1x1x16x16xf32> to vector<1x16x16xf32>
    %c0_17 = arith.constant 0 : index
    %c2_18 = arith.constant 2 : index
    %c0_19 = arith.constant 0 : index
    %c0_20 = arith.constant 0 : index
    %13 = vector.load %arg2[%c0_17, %c2_18, %c0_19, %c0_20] : memref<1x3x16x16xf32, #tpu.memory_space<vmem>>, vector<1x1x16x16xf32>
    %14 = vector.shape_cast %13 : vector<1x1x16x16xf32> to vector<1x16x16xf32>
    %15 = arith.subf %12, %14 : vector<1x16x16xf32>
    %16 = arith.addf %10, %15 : vector<1x16x16xf32>
    %17 = vector.extract_strided_slice %16 {offsets = [0, 0, 0], sizes = [1, 14, 16], strides = [1, 1, 1]} : vector<1x16x16xf32> to vector<1x14x16xf32>
    %18 = vector.extract_strided_slice %16 {offsets = [0, 1, 0], sizes = [1, 14, 16], strides = [1, 1, 1]} : vector<1x16x16xf32> to vector<1x14x16xf32>
    %19 = vector.extract_strided_slice %16 {offsets = [0, 2, 0], sizes = [1, 14, 16], strides = [1, 1, 1]} : vector<1x16x16xf32> to vector<1x14x16xf32>
    %20 = arith.subf %17, %19 : vector<1x14x16xf32>
    %21 = arith.addf %17, %19 : vector<1x14x16xf32>
    %22 = arith.addf %21, %18 : vector<1x14x16xf32>
    %23 = vector.extract_strided_slice %20 {offsets = [0, 0, 0], sizes = [1, 14, 14], strides = [1, 1, 1]} : vector<1x14x16xf32> to vector<1x14x14xf32>
    %24 = vector.extract_strided_slice %20 {offsets = [0, 0, 1], sizes = [1, 14, 14], strides = [1, 1, 1]} : vector<1x14x16xf32> to vector<1x14x14xf32>
    %25 = vector.extract_strided_slice %20 {offsets = [0, 0, 2], sizes = [1, 14, 14], strides = [1, 1, 1]} : vector<1x14x16xf32> to vector<1x14x14xf32>
    %26 = vector.extract_strided_slice %22 {offsets = [0, 0, 0], sizes = [1, 14, 14], strides = [1, 1, 1]} : vector<1x14x16xf32> to vector<1x14x14xf32>
    %27 = vector.extract_strided_slice %22 {offsets = [0, 0, 2], sizes = [1, 14, 14], strides = [1, 1, 1]} : vector<1x14x16xf32> to vector<1x14x14xf32>
    %28 = vector.extract_strided_slice %18 {offsets = [0, 0, 0], sizes = [1, 14, 14], strides = [1, 1, 1]} : vector<1x14x16xf32> to vector<1x14x14xf32>
    %29 = vector.extract_strided_slice %18 {offsets = [0, 0, 2], sizes = [1, 14, 14], strides = [1, 1, 1]} : vector<1x14x16xf32> to vector<1x14x14xf32>
    %30 = arith.subf %28, %29 : vector<1x14x14xf32>
    %31 = arith.addf %23, %25 : vector<1x14x14xf32>
    %32 = arith.addf %31, %24 : vector<1x14x14xf32>
    %33 = arith.subf %26, %27 : vector<1x14x14xf32>
    %34 = arith.addf %32, %24 : vector<1x14x14xf32>
    %35 = arith.addf %33, %30 : vector<1x14x14xf32>
    %36 = arith.subf %32, %33 : vector<1x14x14xf32>
    %37 = arith.addf %32, %33 : vector<1x14x14xf32>
    %38 = math.absf %34 : vector<1x14x14xf32>
    %39 = math.absf %35 : vector<1x14x14xf32>
    %40 = arith.addf %38, %39 : vector<1x14x14xf32>
    %41 = math.absf %36 : vector<1x14x14xf32>
    %42 = math.absf %37 : vector<1x14x14xf32>
    %43 = arith.addf %41, %42 : vector<1x14x14xf32>
    %44 = arith.addf %40, %43 : vector<1x14x14xf32>
    %45 = vector.shape_cast %44 : vector<1x14x14xf32> to vector<1x1x14x14xf32>
    %cst = arith.constant dense<0.000000e+00> : vector<1xf32>
    %46 = vector.multi_reduction <add>, %45, %cst [1, 2, 3] : vector<1x1x14x14xf32> to vector<1xf32>
    %47 = vector.shape_cast %46 : vector<1xf32> to vector<1x1x1x1xf32>
    %48 = vector.extract %47[0, 0, 0, 0] : f32 from vector<1x1x1x1xf32>
    %49 = vector.broadcast %48 : f32 to vector<1x1x1xf32>
    %c0_21 = arith.constant 0 : index
    %c0_22 = arith.constant 0 : index
    %c0_23 = arith.constant 0 : index
    %50 = vector.load %arg3[%c0_21, %c0_22, %c0_23] : memref<1x1x1xf32, #tpu.memory_space<vmem>>, vector<1x1x1xf32>
    tpu.vector_store %arg3[%c0_21, %c0_22, %c0_23], %49 {strides = array<i32>} : memref<1x1x1xf32, #tpu.memory_space<vmem>>, vector<1x1x1xf32>,
    return
  }
  func.func @transform_0(%arg0: i32) -> (i32, i32, i32, i32) {
    %c0_i32 = arith.constant 0 : i32
    %c0_i32_0 = arith.constant 0 : i32
    %c0_i32_1 = arith.constant 0 : i32
    %c0_i32_2 = arith.constant 0 : i32
    return %arg0, %c0_i32, %c0_i32_0, %c0_i32_1 : i32, i32, i32, i32
  }
  func.func @transform_1(%arg0: i32) -> (i32, i32, i32, i32) {
    %c0_i32 = arith.constant 0 : i32
    %c0_i32_0 = arith.constant 0 : i32
    %c0_i32_1 = arith.constant 0 : i32
    %c0_i32_2 = arith.constant 0 : i32
    return %arg0, %c0_i32, %c0_i32_0, %c0_i32_1 : i32, i32, i32, i32
  }
  func.func @transform_2(%arg0: i32) -> (i32, i32, i32) {
    %c0_i32 = arith.constant 0 : i32
    %c0_i32_0 = arith.constant 0 : i32
    %c0_i32_1 = arith.constant 0 : i32
    return %arg0, %c0_i32, %c0_i32_0 : i32, i32, i32
  }
}

</mosaic_0001>

<bundles_post_ra>
// kernel: tpu_custom_call.1
= control target key start
LH: loop header
LB: loop body
LE: loop exit
PB: predicated region body
PF: predicated region fallthrough
CT: control target
= control target key end

     0   :  { %7 = vsyncpa [#allocation3], 0  ;;  %s764_s0 = inlined_call_operand.hbm [shape: f32[2,3,16,16], index: 0, kind: input, shape index: {}]   ;;  %s765_s1 = inlined_call_operand.hbm [shape: f32[2,3,16,16], index: 1, kind: input, shape index: {}]   ;;  %s766_s2 = inlined_call_operand.vmem [shape: f32[2,1,1], index: 2, kind: output, shape index: {}]  }
   0x1   :  { %9 = vsyncpa [#allocation3 + $0x1], 0 }
   0x2   :  { %10 = vsyncpa [#allocation5], 0 }
   0x3   :  { %12 = vsyncpa [#allocation5 + $0x1], 0  ;;  %s598_s9 = smov 0   ;;  %s600_s10 = smov 0  }
   0x4   :  { %s602_s11 = smov 0   ;;  %s604_s12 = smov 0  }
   0x5 LB: > { %s617_s13 = sadd.s32 4294967295, %s575_s12   ;;  %s620_s14 = sadd.s32 1, %s575_s12   ;;  %s575_s12 = sphi %s604_s12, %s776_s12   ;;  %s571_s11 = sphi %s602_s11, %s775_s11   ;;  %s567_s10 = sphi %s600_s10, %s774_s10   ;;  %s563_s9 = sphi %s598_s9, %s773_s9  }
   0x6   : > { %s22_s15 = ssub.s32 %s575_s12, %s620_s14  ;;  %s25_s16 = sadd.s32 1, %s571_s11 }
   0x7   : > { %p23_p0 = scmp.eq.s32.totalorder %s22_s15, 0  ;;  %p32_p1 = scmp.ne.s32.totalorder %s571_s11, %s567_s10 }
   0x8   : > { %p33_p2 = scmp.eq.s32.totalorder %s575_s12, 0  ;;  %p38_p3 = scmp.ne.s32.totalorder %s567_s10, %s563_s9 }
   0x9   : > { %s630_s17 = scalar_select %p23_p0, %s571_s11, %s25_s16  }
   0xa   : > { %p34_p4 = por %p33_p2, %p32_p1  ;;  %p39_p5 = scmp.eq.s32.totalorder %s617_s13, 0 }
   0xb   : > { %p444_p6 = scmp.lt.s32.totalorder %s575_s12, 2  ;;  %s639_s19 = sand.u32 1, %s571_s11  }
   0xc   : > { %p634_p7 = por %p39_p5, %p38_p3  ;;  %s426_s20 = smul.u32 48, %s639_s19 }
   0xd   : > { %s427_s21 = smul.u32 768, %s575_s12  ;;  %p643_p8 = pnand %p444_p6, %p34_p4 }
   0xe   : > { %s768_s18 = scalar_select %p634_p7, 1, 0 }
   0xf   : > { %s652_s25 = scalar_lea.hbm %s764_s0, %s427_s21  ;;  %s118_s26 = scalar_lea.vmem [#allocation2], %s426_s20 }
  0x10   : > { %s125_s27 = sshll.u32 %s118_s26, 4  ;;  %s115_s28 = scalar_lea.sflag [#allocation3], %s639_s19  ;;  %s656_s27 = int_to_ptr.vmem [resolvable:$true] %s125_s27 }
  0x11   : > { %s481_s29 = scalar_lea.hbm %s652_s25, 768  ;;  %p483_p11 = pneg %p643_p8 }
  0x12   : > { %p482_p10 = scmp.ne.s32.totalorder %s652_s25, %s481_s29  ;;  %s486_s4 = scalar_lea.hbm %s764_s0, 1536 }
  0x13   : > { %p487_p0 = scmp.lt.s32.totalorder %s652_s25, %s764_s0  ;;  %p488_p1 = scmp.lt.s32.totalorder %s486_s4, %s481_s29 }
  0x14   : > { %p484_p12 = pnand %p483_p11, %p482_p10 }
  0x15   : > { %p489_p2 = por %p488_p1, %p487_p0 }
  0x16   : > { %p485_p13 = pneg %p484_p12 }
  0x18   : > { %p490_p3 = pnand %p489_p2, %p485_p13 }
  0x1a   : > { %493 = shalt.err (!%p490_p3)
}
  0x1b   : > { %s494_s7 = scalar_lea.vmem %s656_s27, 768  ;;  %s577_s8 = smov [#allocation2]  }
  0x1c   : > { %p495_p4 = scmp.ne.s32.totalorder %s656_s27, %s494_s7  ;;  %s499_s9 = sshll.u32 %s577_s8, 4  ;;  %s500_s9 = int_to_ptr.vmem [resolvable:$false] %s499_s9 }
  0x1d   : > { %s501_s15 = scalar_lea.vmem %s500_s9, 1536  ;;  %p502_p10 = scmp.lt.s32.totalorder %s656_s27, %s500_s9 }
  0x1e   : > { %p497_p5 = pnand %p495_p4, %p483_p11  ;;  %p503_p12 = scmp.lt.s32.totalorder %s501_s15, %s494_s7 }
  0x20   : > { %p498_p6 = pneg %p497_p5  ;;  %p504_p9 = por %p503_p12, %p502_p10 }
  0x22   : > { %p505_p0 = pnand %p504_p9, %p498_p6 }
  0x24   : > { %508 = shalt.err (!%p505_p0)
}
  0x25   : > { %s578_s16 = smov 128   ;;  %s579_s23 = smov 8  }
  0x26   : > { %440 = dma.hbm_to_vmem [thread:$0]  (!%p643_p8), %s652_s25, 768, %s656_s27, %s115_s28, %s578_s16, %s578_s16, %s579_s23  }
  0x27   : > { %p154_p9 = scmp.lt.s32.totalorder %s575_s12, 3  ;;  %s695_s29 = scalar_lea.hbm %s765_s1, %s427_s21 }
  0x28   : > { %p770_p13 = scmp.ge.s32.totalorder %s575_s12, 1  ;;  %s139_s3 = scalar_lea.vmem [#allocation4], %s426_s20 }
  0x29   : > { %s146_s4 = sshll.u32 %s139_s3, 4  ;;  %s136_s25 = scalar_lea.sflag [#allocation5], %s639_s19  ;;  %s705_s4 = int_to_ptr.vmem [resolvable:$true] %s146_s4 }
  0x2a   : > { %p699_p1 = pnand %p770_p13, %p154_p9  ;;  %s509_s27 = scalar_lea.hbm %s695_s29, 768 }
  0x2b   : > { %p510_p2 = scmp.ne.s32.totalorder %s695_s29, %s509_s27  ;;  %s514_s28 = scalar_lea.hbm %s765_s1, 1536 }
  0x2c   : > { %p515_p5 = scmp.lt.s32.totalorder %s695_s29, %s765_s1  ;;  %p516_p6 = scmp.lt.s32.totalorder %s514_s28, %s509_s27 }
  0x2d   : > { %p512_p3 = pnand %p510_p2, %p483_p11 }
  0x2e   : > { %p517_p10 = por %p516_p6, %p515_p5 }
  0x2f   : > { %p513_p4 = pneg %p512_p3 }
  0x31   : > { %p518_p12 = pnand %p517_p10, %p513_p4 }
  0x33   : > { %521 = shalt.err (!%p518_p12)
}
  0x34   : > { %s522_s19 = scalar_lea.vmem %s705_s4, 768  ;;  %s580_s20 = smov [#allocation4]  }
  0x35   : > { %p523_p0 = scmp.ne.s32.totalorder %s705_s4, %s522_s19  ;;  %s527_s7 = sshll.u32 %s580_s20, 4  ;;  %s528_s7 = int_to_ptr.vmem [resolvable:$false] %s527_s7 }
  0x36   : > { %s529_s8 = scalar_lea.vmem %s528_s7, 1536  ;;  %p530_p2 = scmp.lt.s32.totalorder %s705_s4, %s528_s7 }
  0x37   : > { %p525_p9 = pnand %p523_p0, %p483_p11  ;;  %p531_p3 = scmp.lt.s32.totalorder %s529_s8, %s522_s19 }
  0x39   : > { %p526_p13 = pneg %p525_p9  ;;  %p532_p7 = por %p531_p3, %p530_p2 }
  0x3b   : > { %p533_p5 = pnand %p532_p7, %p526_p13 }
  0x3d   : > { %536 = shalt.err (!%p533_p5)
}
  0x3e   : > { %443 = dma.hbm_to_vmem [thread:$0]  (!%p643_p8), %s695_s29, 768, %s705_s4, %s136_s25, %s578_s16, %s578_s16, %s579_s23  }
  0x3f   : > { %158 = sbr.rel (%p699_p1) target bundleno = 428 (0x1ac), region = 28  ;;  %s160_s9 = sand.u32 (!%p699_p1), 1, %s567_s10  }
  0x40   : > { %s430_s15 = smul.u32 (!%p699_p1), 48, %s160_s9  ;;  %s161_s24 = scalar_lea.sflag (!%p699_p1), [#allocation3], %s160_s9 }
  0x41   : > { %p772_p11 = scmp.ne.s32.totalorder (!%p699_p1), %s768_s18, 0 }
  0x42   : > { %s164_s26 = scalar_lea.vmem (!%p699_p1), [#allocation2], %s430_s15 }
  0x44   : > { %554 = dma.done.wait (%p772_p11), %s161_s24, 768  }
  0x45   : > { %556 = vsyncadd (%p772_p11), %s161_s24, 4294966528  ;;  %s170_s22 = scalar_lea.sflag [#allocation5], %s160_s9  ;;  %s173_s3 = scalar_lea.vmem [#allocation4], %s430_s15 }
  0x46   : > { %558 = dma.done.wait (%p772_p11), %s170_s22, 768  }
  0x47   : > { %560 = vsyncadd (%p772_p11), %s170_s22, 4294966528  ;;  %v200_v0 = vld [vmem:[%s164_s26] sm:$0xff]  ;;  %v416_v2 = vld [vmem:[%s164_s26 + $0x10] sm:$0xff]  ;;  %s581_s18 = smov 126   ;;  %vm228_vm0 = vcmask 1045504   ;;  %vm238_vm1 = vcmask 1046528  }
  0x48   : > { %v202_v1 = vld [vmem:[%s173_s3] sm:$0xff]  ;;  %v418_v4 = vld [vmem:[%s173_s3 + $0x10] sm:$0xff]  ;;  %v201_v9 = vld [vmem:[%s164_s26 + $0x8] sm:$0xff]  ;;  %s582_s16 = smov 127   ;;  %vm311_vm2 = vcmask 113664   ;;  %vm313_vm3 = vcmask 111616  }
  0x49   : > { %v204_v3 = vsub.f32 %v200_v0, %v202_v1  ;;  %v420_v5 = vld [vmem:[%s164_s26 + $0x20] sm:$0xff]  ;;  %v212_v7 = vsub.f32 %v416_v2, %v418_v4  ;;  %v203_v10 = vld [vmem:[%s173_s3 + $0x8] sm:$0xff]  ;;  %v417_v11 = vld [vmem:[%s164_s26 + $0x18] sm:$0xff]  ;;  %p197_p7 = scmp.lt.s32.totalorder %s617_s13, 1  ;;  %vm326_vm4 = vcmask 0  }
  0x4a   : > { %v422_v6 = vld [vmem:[%s173_s3 + $0x20] sm:$0xff]  ;;  %v205_v12 = vsub.f32 %v201_v9, %v203_v10  ;;  %v419_v13 = vld [vmem:[%s173_s3 + $0x18] sm:$0xff]  ;;  %v421_v14 = vld [vmem:[%s164_s26 + $0x28] sm:$0xff] }
  0x4b   : > { %v222_v8 = vsub.f32 %v420_v5, %v422_v6  ;;  %v423_v15 = vld [vmem:[%s173_s3 + $0x28] sm:$0xff]  ;;  %v214_v16 = vadd.f32 %v212_v7, %v204_v3  ;;  %v213_v17 = vsub.f32 %v417_v11, %v419_v13  ;;  %s778_s13 = smov (!%p197_p7, %s617_s13), 1 }
  0x4c   : > { %v223_v18 = vsub.f32 %v421_v14, %v423_v15  ;;  %s199_s30 = scalar_lea.vmem %s766_s2, %s778_s13 }
  0x4d   : > { %v224_v19 = vadd.f32 %v222_v8, %v214_v16  ;;  %v215_v20 = vadd.f32 %v213_v17, %v205_v12 }
  0x4f   : > { %246 = vrot.lane.b32.xlu0 %v224_v19, %s581_s18  ;;  %v225_v21 = vadd.f32 %v223_v18, %v215_v20  ;;  %v229_v22 = vrot.slane %v224_v19, 2  ;;  %v239_v23 = vrot.slane %v224_v19, 1 }
  0x51   : > { %v230_v24 = vrot.slane %v225_v21, 2  ;;  %v240_v25 = vrot.slane %v225_v21, 1 }
  0x53   : > { %v235_v26 = vsub.f32 %v225_v21, %v230_v24  ;;  %248 = vrot.lane.b32.xlu0 %v225_v21, %s581_s18  ;;  %v231_v27 = vsel %vm228_vm0, %v229_v22, %v230_v24  ;;  %v241_v30 = vsel %vm238_vm1, %v239_v23, %v240_v25  ;;  %v237_v32 = vadd.f32 %v230_v24, %v225_v21 }
  0x54   : > { %v234_v28 = vsub.f32 %v224_v19, %v231_v27  ;;  %v236_v29 = vadd.f32 %v231_v27, %v224_v19 }
  0x55   : > { %258 = vrot.lane.b32.xlu1 %v235_v26, %s581_s18  ;;  %v245_v33 = vadd.f32 %v240_v25, %v237_v32 }
  0x56   : > { %v244_v31 = vadd.f32 %v241_v30, %v236_v29 }
  0x57   : > { %264 = vrot.lane.b32.xlu0 %v234_v28, %s582_s16 }
  0x59   : > { %266 = vrot.lane.b32.xlu1 %v235_v26, %s582_s16 }
  0x5b   : > { %274 = vrot.lane.b32.xlu0 %v244_v31, %s581_s18 }
  0x5d   : > { %256 = vrot.lane.b32.xlu1 %v234_v28, %s581_s18 }
  0x61   : > { %276 = vrot.lane.b32.xlu1 %v245_v33, %s581_s18 }
  0xc1   : > { %v247_v34 = vpop.permute.xlu0 %246 }
  0xc2   : > { %v252_v37 = vsub.f32 %v224_v19, %v247_v34 }
  0xc4   : > { %v286_v41 = vrot.slane %v252_v37, 1 }
  0xc5   : > { %v249_v35 = vpop.permute.xlu0 %248 }
  0xc6   : > { %v253_v38 = vsub.f32 %v225_v21, %v249_v35 }
  0xc7   : > { %v259_v36 = vpop.permute.xlu1 %258 }
  0xc8   : > { %v287_v42 = vrot.slane %v253_v38, 1  ;;  %v263_v43 = vadd.f32 %v259_v36, %v235_v26 }
  0xc9   : > { %v265_v39 = vpop.permute.xlu0 %264 }
  0xca   : > { %v288_v48 = vsel %vm238_vm1, %v286_v41, %v287_v42 }
  0xcb   : > { %v267_v40 = vpop.permute.xlu1 %266 }
  0xcc   : > { %v271_v46 = vadd.f32 %v267_v40, %v263_v43 }
  0xcd   : > { %v275_v44 = vpop.permute.xlu0 %274 }
  0xce   : > { %v280_v45 = vsub.f32 %v244_v31, %v275_v44  ;;  %v283_v52 = vadd.f32 %v271_v46, %v267_v40 }
  0xcf   : > { %v257_v47 = vpop.permute.xlu1 %256 }
  0xd0   : > { %v262_v49 = vadd.f32 %v257_v47, %v234_v28  ;;  %v291_v50 = vadd.f32 %v288_v48, %v280_v45  ;;  %v298_v1 = vand.u32 2147483647, %v283_v52 }
  0xd2   : > { %v270_v51 = vadd.f32 %v265_v39, %v262_v49  ;;  %v299_v58 = vand.u32 2147483647, %v291_v50 }
  0xd3   : > { %v277_v53 = vpop.permute.xlu1 %276 }
  0xd4   : > { %v282_v54 = vadd.f32 %v270_v51, %v265_v39  ;;  %v293_v55 = vsub.f32 %v270_v51, %v280_v45  ;;  %v295_v56 = vadd.f32 %v280_v45, %v270_v51  ;;  %v281_v57 = vsub.f32 %v245_v33, %v277_v53 }
  0xd6   : > { %v297_v59 = vand.u32 2147483647, %v282_v54  ;;  %v303_v60 = vand.u32 2147483647, %v293_v55  ;;  %v305_v61 = vand.u32 2147483647, %v295_v56  ;;  %v292_v62 = vadd.f32 %v287_v42, %v281_v57 }
  0xd7   : > { %v294_v63 = vsub.f32 %v271_v46, %v281_v57  ;;  %v296_v0 = vadd.f32 %v281_v57, %v271_v46 }
  0xd8   : > { %v300_v2 = vand.u32 2147483647, %v292_v62  ;;  %v301_v3 = vadd.f32 %v299_v58, %v297_v59  ;;  %v307_v4 = vadd.f32 %v305_v61, %v303_v60 }
  0xd9   : > { %v304_v5 = vand.u32 2147483647, %v294_v63  ;;  %v306_v6 = vand.u32 2147483647, %v296_v0 }
  0xda   : > { %v302_v7 = vadd.f32 %v300_v2, %v298_v1  ;;  %v309_v9 = vadd.f32 %v307_v4, %v301_v3 }
  0xdb   : > { %v308_v8 = vadd.f32 %v306_v6, %v304_v5 }
  0xdc   : > { %v312_v11 = vsel %vm311_vm2, %v309_v9, 0.0 }
  0xdd   : > { %v310_v10 = vadd.f32 %v308_v8, %v302_v7 }
  0xdf   : > { %v314_v12 = vsel %vm313_vm3, %v310_v10, 0.0 }
  0xe0   : > { %v315_v13 = vadd.f32 %v314_v12, %v312_v11 }
  0xe2   : > { %316 = vadd.xlane.f32.xlu0 %v315_v13 }
 0x16b   : > { %v317_v14 = vpop.xlane.xlu0 %316 }
 0x16c   : > { %v318_v15 = vrot.slane %v317_v14, 4 }
 0x16e   : > { %v319_v16 = vadd.f32 %v318_v15, %v317_v14 }
 0x170   : > { %v320_v17 = vrot.slane %v319_v16, 2 }
 0x172   : > { %v321_v18 = vadd.f32 %v320_v17, %v319_v16 }
 0x174   : > { %v322_v19 = vrot.slane %v321_v18, 1 }
 0x176   : > { %v323_v20 = vadd.f32 %v322_v19, %v321_v18 }
 0x178   : > { %431 = vpush %v323_v20 }
 0x1a9   : > { %s432_s4 = spop %431 }
 0x1aa   : > { %v325_v21 = vstv %s432_s4 }
 0x1ab   : > { %327 = vst.msk [vmem:[%s199_s30] sm:$0x1] %vm326_vm4, %v325_v21 }
 0x1ac PF: > { %p15_p8 = scmp.ge.s32.totalorder %s620_s14, 4   ;;  %s773_s9 = smov %s567_s10 }
 0x1ad   : > { %s774_s10 = smov %s571_s11  ;;  %s775_s11 = smov %s630_s17 }
 0x1ae   : > { %s776_s12 = smov %s620_s14  ;;  %17 = sbr.rel (!%p15_p8) target bundleno = 5 (0x5), region = 85 }
 0x1b3   :  { %345 = vsyncpa [#allocation3], 1 }
 0x1b4   :  { %347 = vsyncpa [#allocation3 + $0x1], 1 }
 0x1b5   :  { %348 = vsyncpa [#allocation5], 1 }
 0x1b6   :  { %350 = vsyncpa [#allocation5 + $0x1], 1 }

</bundles_post_ra>
